<compile_context>
chip_gen: v6e
topology: v6e:2x2x1
jax: 0.10.0
libtpu: 0.0.40
codegen_flags: <defaults>
</compile_context>

<pallas_src>
import math
import numpy as np
import jax
import jax.numpy as jnp
from jax.experimental import pallas as pl
from jax.experimental.pallas import tpu as pltpu


# ----------------------------------------------------------------------------
# resample() = reflect-pad lanczos conv + bicubic interpolation, expressed as
# dense matrices (built in numpy; pure parameter setup / glue).
# ----------------------------------------------------------------------------
def _sinc(x):
    return np.where(x != 0, np.sin(np.pi * x) / (np.pi * x), 1.0)


def _lanczos(x, a):
    cond = np.logical_and(-a < x, x < a)
    out = np.where(cond, _sinc(x) * _sinc(x / a), 0.0)
    return out / out.sum()


def _ramp(ratio, width):
    n = math.ceil(width / ratio + 1)
    out = np.arange(n, dtype=np.float64) * ratio
    full = np.concatenate([-out[1:][::-1], out])
    return full[1:-1]


def _reflect_conv_matrix(h, kernel):
    """Matrix form of reflect-pad + 1-D cross-correlation (same-size output)."""
    k = len(kernel)
    pad = (k - 1) // 2
    m = np.zeros((h, h), dtype=np.float64)
    for i in range(h):
        for j in range(k):
            p = i + j - pad
            if p < 0:
                p = -p
            elif p >= h:
                p = 2 * (h - 1) - p
            m[i, p] += kernel[j]
    return m


def _bicubic_matrix(out_size, in_size, a=-0.75):
    """PyTorch bicubic (A=-0.75), align_corners=True, as a dense matrix."""
    def c1(x):
        return ((a + 2.0) * x - (a + 3.0)) * x * x + 1.0

    def c2(x):
        return ((a * x - 5.0 * a) * x + 8.0 * a) * x - 4.0 * a

    m = np.zeros((out_size, in_size), dtype=np.float64)
    for i in range(out_size):
        x = 0.0 if out_size == 1 else i * (in_size - 1) / (out_size - 1)
        x0 = math.floor(x)
        t = x - x0
        w = [c2(t + 1.0), c1(t), c1(1.0 - t), c2(2.0 - t)]
        for kk in range(4):
            idx = min(max(x0 - 1 + kk, 0), in_size - 1)
            m[i, idx] += w[kk]
    return m


def _resample_matrix(cut_size, size):
    """Combined (bicubic . lanczos-conv) operator: [cut_size, size]."""
    m = _bicubic_matrix(cut_size, size)
    if cut_size < size:                       # torch only anti-aliases on downsample
        kern = _lanczos(_ramp(cut_size / size, 2), 2)
        m = m @ _reflect_conv_matrix(size, kern)
    return m.astype(np.float32)


# ----------------------------------------------------------------------------
# Pallas kernel.  Per cutout i:
#   T = x_flat @ MX_i^T                   (one tall fused bf16 matmul)
#   out[:, b*cs:(b+1)*cs] = clip(MY_i @ T_b + fac_b * noise_b, 0, 1)
# ----------------------------------------------------------------------------
def _cutout_kernel(my_ref, mxT_ref, x_ref, noise_ref, facs_ref, o_ref, t_ref):
    i = pl.program_id(0)
    cs = my_ref.shape[1]
    side_y = my_ref.shape[2]
    nc = o_ref.shape[2] // cs

    # Step 1 — fused over all N*C planes: [nc*sideY, sideX] @ [sideX, cs].
    # Large M (nc*sideY rows streamed through the MXU), f32 accumulation.
    t_ref[...] = jax.lax.dot_general(
        x_ref[...], mxT_ref[0],
        dimension_numbers=(((1,), (0,)), ((), ())),
        preferred_element_type=jnp.float32,
    ).astype(t_ref.dtype)

    my = my_ref[0]                                     # [cs, sideY] bf16 (hoisted)

    # Step 2 — per (N*C) plane projection onto a lane-dense [cs, nc*cs] slab.
    # nc = N*C is tiny; a static Python loop keeps every slice offset static so
    # the minor-dim stores lower to plain (masked) vst with no dynamic lane
    # offsets.  The fully-fused variant would need an in-kernel
    # (nc, sideY, cs) -> (sideY, nc*cs) permute, avoided here for robustness.
    for b in range(nc):
        tb = t_ref[b * side_y:(b + 1) * side_y, :]     # [sideY, cs] bf16
        yb = jax.lax.dot_general(
            my, tb,
            dimension_numbers=(((1,), (0,)), ((), ())),
            preferred_element_type=jnp.float32)        # [cs, cs] f32
        fac = facs_ref[i, b]                           # scalar from SMEM
        nb = noise_ref[0, :, b * cs:(b + 1) * cs]      # [cs, cs] f32
        o_ref[0, :, b * cs:(b + 1) * cs] = jnp.clip(yb + fac * nb, 0.0, 1.0)


def cutouts_pallas(my_all, mxT_all, x_flat, noise_wide, facs_nc):
    cutn, cs, side_y = my_all.shape
    side_x = mxT_all.shape[1]
    rows = x_flat.shape[0]              # nc * side_y
    nc = rows // side_y
    wide = noise_wide.shape[2]          # nc * cs   (lane-dense output width)

    flops = 2 * cutn * (rows * side_x * cs + nc * cs * cs * side_y)
    bytes_accessed = ((my_all.size + mxT_all.size + x_flat.size) * 2
                      + (noise_wide.size + facs_nc.size) * 4
                      + cutn * cs * wide * 4)

    return pl.pallas_call(
        _cutout_kernel,
        out_shape=jax.ShapeDtypeStruct((cutn, cs, wide), jnp.float32),
        grid_spec=pltpu.PrefetchScalarGridSpec(
            num_scalar_prefetch=0,
            grid=(cutn,),
            in_specs=[
                pl.BlockSpec((1, cs, side_y), lambda i: (i, 0, 0)),   # MY_i
                pl.BlockSpec((1, side_x, cs), lambda i: (i, 0, 0)),   # MX_i^T
                # Single image, constant block index -> DMA'd once, not per cutout.
                pl.BlockSpec((rows, side_x), lambda i: (0, 0)),
                pl.BlockSpec((1, cs, wide), lambda i: (i, 0, 0)),     # noise slab
                pl.BlockSpec(memory_space=pltpu.MemorySpace.SMEM),    # facs scalars
            ],
            out_specs=pl.BlockSpec((1, cs, wide), lambda i: (i, 0, 0)),
            scratch_shapes=[pltpu.VMEM((rows, cs), jnp.bfloat16)],
        ),
        compiler_params=pltpu.CompilerParams(
            dimension_semantics=("parallel",),        # cutn split across TCs (v7x)
            # Raised above the v5e 16 MiB default; still <= v7x's 64 MiB physical.
            vmem_limit_bytes=64 * 1024 * 1024,
        ),
        cost_estimate=pl.CostEstimate(
            flops=int(flops), transcendentals=0, bytes_accessed=int(bytes_accessed)),
    )(my_all, mxT_all, x_flat, noise_wide, facs_nc)


# ----------------------------------------------------------------------------
# Module wrapper.
# ----------------------------------------------------------------------------
class MakeCutoutsOrig:
    def __init__(self, cut_size, cutn, cut_pow=1.0, cutr='augandnoise'):
        self.cut_size = cut_size
        self.cutn = cutn
        self.cut_pow = cut_pow
        self.noise_fac = 0.1
        self.cutr = cutr
        self._resample_cache = {}
        # TODO(synk): kornia augmentations (cutr='withaug': RandomAffine /
        # RandomPerspective / ColorJitter) have no clean Pallas equivalent;
        # that mode falls back to cut + clamp only.

    def _resample_mat(self, size):
        m = self._resample_cache.get(size)
        if m is None:
            m = _resample_matrix(self.cut_size, size)
            self._resample_cache[size] = m
        return m

    def __call__(self, x, key, np_rng, return_debug=False):
        n, c, sideY, sideX = x.shape
        max_size = min(sideX, sideY)
        min_size = min(sideX, sideY, self.cut_size)
        cs = self.cut_size
        nc = n * c

        # Per-cutout resize operators over the full image (zero-shifted columns
        # select the cutout window; reflect padding is cutout-internal, matching
        # the reference which pads the already-cut tensor).  Host numpy RNG ->
        # no device->host syncs, and all device shapes stay static across calls.
        my_np = np.zeros((self.cutn, cs, sideY), np.float32)
        mxT_np = np.zeros((self.cutn, sideX, cs), np.float32)
        for i in range(self.cutn):
            r = float(np_rng.random())
            size = int(r ** self.cut_pow * (max_size - min_size) + min_size)
            ox = int(np_rng.integers(0, sideX - size + 1))
            oy = int(np_rng.integers(0, sideY - size + 1))
            m = self._resample_mat(size)                    # [cs, size]
            my_np[i, :, oy:oy + size] = m
            mxT_np[i, ox:ox + size, :] = m.T

        my_all = jnp.asarray(my_np, dtype=jnp.bfloat16)     # [cutn, cs, sideY]
        mxT_all = jnp.asarray(mxT_np, dtype=jnp.bfloat16)   # [cutn, sideX, cs]
        x_flat = x.reshape(nc * sideY, sideX).astype(jnp.bfloat16)

        # noise: facs ~ U(0, noise_fac) per (cutout, n) row; randn_like(cutouts).
        key, kf, kn = jax.random.split(key, 3)
        if self.cutr == 'augandnoise' and self.noise_fac:
            facs = jax.random.uniform(kf, (self.cutn * n,), jnp.float32,
                                      0.0, self.noise_fac)
        else:
            facs = jnp.zeros((self.cutn * n,), jnp.float32)
        facs_nc = jnp.broadcast_to(facs.reshape(self.cutn, n, 1),
                                   (self.cutn, n, c)).reshape(self.cutn, nc)
        noise4 = jax.random.normal(kn, (self.cutn, nc, cs, cs), jnp.float32)
        noise_wide = (noise4.transpose(0, 2, 1, 3)
                            .reshape(self.cutn, cs, nc * cs))

        out_wide = cutouts_pallas(my_all, mxT_all, x_flat, noise_wide, facs_nc)

        out = (out_wide.reshape(self.cutn, cs, nc, cs)
                       .transpose(0, 2, 1, 3)
                       .reshape(self.cutn * n, c, cs, cs))

        if return_debug:
            dbg = dict(my=my_all, mxT=mxT_all, x_flat=x_flat,
                       noise=noise_wide, facs=facs_nc, out_wide=out_wide)
            return out, dbg
        return out


if __name__ == "__main__":
    key = jax.random.PRNGKey(0)
    key, kin = jax.random.split(key)
    N, C, H, W = 2, 3, 16, 16
    cut_size, cutn = 8, 4
    x = jax.random.uniform(kin, (N, C, H, W), dtype=jnp.float32)

    mc = MakeCutoutsOrig(cut_size=cut_size, cutn=cutn, cut_pow=1.0,
                         cutr='augandnoise')
    np_rng = np.random.default_rng(0)
    out, dbg = mc(x, key, np_rng, return_debug=True)
    out = jax.block_until_ready(out)

    # Reference check (plain JAX, same bf16 input quantization as the kernel;
    # tolerance is loose because the kernel rounds the step-1 result to bf16
    # and MXU/XLA f32 accumulation orders differ).
    nc = N * C
    hp = jax.lax.Precision.HIGHEST
    myf = dbg['my'].astype(jnp.float32)                     # [cutn, cs, H]
    mxTf = dbg['mxT'].astype(jnp.float32)                   # [cutn, W, cs]
    xf = dbg['x_flat'].astype(jnp.float32)                  # [nc*H, W]
    t = jnp.einsum('rt,itd->ird', xf, mxTf, precision=hp)
    t = t.astype(jnp.bfloat16).astype(jnp.float32).reshape(cutn, nc, H, cut_size)
    y = jnp.einsum('ics,ibsd->ibcd', myf, t, precision=hp)  # [cutn, nc, cs, cs]
    y_wide = y.transpose(0, 2, 1, 3).reshape(cutn, cut_size, nc * cut_size)
    fac_wide = jnp.broadcast_to(dbg['facs'][:, None, :, None],
                                (cutn, cut_size, nc, cut_size)
                                ).reshape(cutn, cut_size, nc * cut_size)
    ref_wide = jnp.clip(y_wide + fac_wide * dbg['noise'], 0.0, 1.0)
    np.testing.assert_allclose(np.asarray(dbg['out_wide']), np.asarray(ref_wide),
                               rtol=5e-2, atol=5e-2)

    assert out.shape == (cutn * N, C, cut_size, cut_size)
    assert bool(jnp.all(out >= 0.0)) and bool(jnp.all(out <= 1.0))
    print("KERNEL_OK")
</pallas_src>

<mosaic_0001>
module attributes {stable_mosaic.version = 11 : i64} {
  func.func @_cutout_kernel(%arg0: i32, %arg1: memref<1x8x16xbf16, #tpu.memory_space<vmem>>, %arg2: memref<1x16x8xbf16, #tpu.memory_space<vmem>>, %arg3: memref<96x16xbf16, #tpu.memory_space<vmem>>, %arg4: memref<1x8x48xf32, #tpu.memory_space<vmem>>, %arg5: memref<4x6xf32, #tpu.memory_space<smem>>, %arg6: memref<1x8x48xf32, #tpu.memory_space<vmem>>, %arg7: memref<96x8xbf16, #tpu.memory_space<vmem>>) attributes {dimension_semantics = [#tpu.dimension_semantics<parallel>], iteration_bounds = array<i64: 4>, scalar_prefetch = 0 : i64, scratch_operands = 1 : i64, tpu.core_type = #tpu.core_type<tc>, window_params = [{transform_indices = @transform_0, window_bounds = array<i64: 1, 8, 16>}, {transform_indices = @transform_1, window_bounds = array<i64: 1, 16, 8>}, {pipeline_mode = #tpu.pipeline_mode<synchronous>, transform_indices = @transform_2, window_bounds = array<i64: 96, 16>}, {transform_indices = @transform_3, window_bounds = array<i64: 1, 8, 48>}, {transform_indices = @transform_4, window_bounds = array<i64: 4, 6>}, {transform_indices = @transform_5, window_bounds = array<i64: 1, 8, 48>}]} {
    %c0 = arith.constant 0 : index
    %c0_0 = arith.constant 0 : index
    %0 = vector.load %arg3[%c0, %c0_0] : memref<96x16xbf16, #tpu.memory_space<vmem>>, vector<96x16xbf16>
    %c0_1 = arith.constant 0 : index
    %c0_2 = arith.constant 0 : index
    %c0_3 = arith.constant 0 : index
    %1 = vector.load %arg2[%c0_1, %c0_2, %c0_3] : memref<1x16x8xbf16, #tpu.memory_space<vmem>>, vector<1x16x8xbf16>
    %2 = vector.shape_cast %1 : vector<1x16x8xbf16> to vector<16x8xbf16>
    %cst = arith.constant dense<0.000000e+00> : vector<96x8xf32>
    %3 = tpu.matmul %0, %2, %cst {dimension_numbers = #tpu.dot_dimension_numbers<[1], [0], [0], [1], [0, 0, 1, 1], [], []>} : vector<96x16xbf16>, vector<16x8xbf16>, vector<96x8xf32> -> vector<96x8xf32>
    %4 = arith.truncf %3 : vector<96x8xf32> to vector<96x8xbf16>
    %c0_4 = arith.constant 0 : index
    %c0_5 = arith.constant 0 : index
    %5 = vector.load %arg7[%c0_4, %c0_5] : memref<96x8xbf16, #tpu.memory_space<vmem>>, vector<96x8xbf16>
    tpu.vector_store %arg7[%c0_4, %c0_5], %4 {strides = array<i32>} : memref<96x8xbf16, #tpu.memory_space<vmem>>, vector<96x8xbf16>,
    %c0_6 = arith.constant 0 : index
    %c0_7 = arith.constant 0 : index
    %c0_8 = arith.constant 0 : index
    %6 = vector.load %arg1[%c0_6, %c0_7, %c0_8] : memref<1x8x16xbf16, #tpu.memory_space<vmem>>, vector<1x8x16xbf16>
    %7 = vector.shape_cast %6 : vector<1x8x16xbf16> to vector<8x16xbf16>
    %c0_9 = arith.constant 0 : index
    %c0_10 = arith.constant 0 : index
    %8 = vector.load %arg7[%c0_9, %c0_10] : memref<96x8xbf16, #tpu.memory_space<vmem>>, vector<16x8xbf16>
    %cst_11 = arith.constant dense<0.000000e+00> : vector<8x8xf32>
    %9 = tpu.matmul %7, %8, %cst_11 {dimension_numbers = #tpu.dot_dimension_numbers<[1], [0], [0], [1], [0, 0, 1, 1], [], []>} : vector<8x16xbf16>, vector<16x8xbf16>, vector<8x8xf32> -> vector<8x8xf32>
    %10 = arith.index_cast %arg0 : i32 to index
    %c0_12 = arith.constant 0 : index
    %11 = memref.load %arg5[%10, %c0_12] : memref<4x6xf32, #tpu.memory_space<smem>>
    %c0_13 = arith.constant 0 : index
    %c0_14 = arith.constant 0 : index
    %c0_15 = arith.constant 0 : index
    %12 = vector.load %arg4[%c0_13, %c0_14, %c0_15] : memref<1x8x48xf32, #tpu.memory_space<vmem>>, vector<1x8x8xf32>
    %13 = vector.shape_cast %12 : vector<1x8x8xf32> to vector<8x8xf32>
    %14 = vector.broadcast %11 : f32 to vector<8x8xf32>
    %15 = arith.mulf %14, %13 : vector<8x8xf32>
    %16 = arith.addf %9, %15 : vector<8x8xf32>
    %cst_16 = arith.constant 0.000000e+00 : f32
    %cst_17 = arith.constant 1.000000e+00 : f32
    %17 = vector.broadcast %cst_16 : f32 to vector<8x8xf32>
    %18 = arith.maximumf %17, %16 : vector<8x8xf32>
    %19 = vector.broadcast %cst_17 : f32 to vector<8x8xf32>
    %20 = arith.minimumf %19, %18 : vector<8x8xf32>
    %c0_18 = arith.constant 0 : index
    %c0_19 = arith.constant 0 : index
    %c0_20 = arith.constant 0 : index
    %21 = vector.load %arg6[%c0_18, %c0_19, %c0_20] : memref<1x8x48xf32, #tpu.memory_space<vmem>>, vector<1x8x8xf32>
    %22 = vector.shape_cast %21 : vector<1x8x8xf32> to vector<8x8xf32>
    %23 = vector.shape_cast %20 : vector<8x8xf32> to vector<1x8x8xf32>
    tpu.vector_store %arg6[%c0_18, %c0_19, %c0_20], %23 {strides = array<i32>} : memref<1x8x48xf32, #tpu.memory_space<vmem>>, vector<1x8x8xf32>,
    %c16 = arith.constant 16 : index
    %c0_21 = arith.constant 0 : index
    %24 = vector.load %arg7[%c16, %c0_21] : memref<96x8xbf16, #tpu.memory_space<vmem>>, vector<16x8xbf16>
    %cst_22 = arith.constant dense<0.000000e+00> : vector<8x8xf32>
    %25 = tpu.matmul %7, %24, %cst_22 {dimension_numbers = #tpu.dot_dimension_numbers<[1], [0], [0], [1], [0, 0, 1, 1], [], []>} : vector<8x16xbf16>, vector<16x8xbf16>, vector<8x8xf32> -> vector<8x8xf32>
    %26 = arith.index_cast %arg0 : i32 to index
    %c1 = arith.constant 1 : index
    %27 = memref.load %arg5[%26, %c1] : memref<4x6xf32, #tpu.memory_space<smem>>
    %c0_23 = arith.constant 0 : index
    %c0_24 = arith.constant 0 : index
    %c8 = arith.constant 8 : index
    %28 = vector.load %arg4[%c0_23, %c0_24, %c8] : memref<1x8x48xf32, #tpu.memory_space<vmem>>, vector<1x8x8xf32>
    %29 = vector.shape_cast %28 : vector<1x8x8xf32> to vector<8x8xf32>
    %30 = vector.broadcast %27 : f32 to vector<8x8xf32>
    %31 = arith.mulf %30, %29 : vector<8x8xf32>
    %32 = arith.addf %25, %31 : vector<8x8xf32>
    %cst_25 = arith.constant 0.000000e+00 : f32
    %cst_26 = arith.constant 1.000000e+00 : f32
    %33 = vector.broadcast %cst_25 : f32 to vector<8x8xf32>
    %34 = arith.maximumf %33, %32 : vector<8x8xf32>
    %35 = vector.broadcast %cst_26 : f32 to vector<8x8xf32>
    %36 = arith.minimumf %35, %34 : vector<8x8xf32>
    %c0_27 = arith.constant 0 : index
    %c0_28 = arith.constant 0 : index
    %c8_29 = arith.constant 8 : index
    %37 = vector.load %arg6[%c0_27, %c0_28, %c8_29] : memref<1x8x48xf32, #tpu.memory_space<vmem>>, vector<1x8x8xf32>
    %38 = vector.shape_cast %37 : vector<1x8x8xf32> to vector<8x8xf32>
    %39 = vector.shape_cast %36 : vector<8x8xf32> to vector<1x8x8xf32>
    tpu.vector_store %arg6[%c0_27, %c0_28, %c8_29], %39 {strides = array<i32>} : memref<1x8x48xf32, #tpu.memory_space<vmem>>, vector<1x8x8xf32>,
    %c32 = arith.constant 32 : index
    %c0_30 = arith.constant 0 : index
    %40 = vector.load %arg7[%c32, %c0_30] : memref<96x8xbf16, #tpu.memory_space<vmem>>, vector<16x8xbf16>
    %cst_31 = arith.constant dense<0.000000e+00> : vector<8x8xf32>
    %41 = tpu.matmul %7, %40, %cst_31 {dimension_numbers = #tpu.dot_dimension_numbers<[1], [0], [0], [1], [0, 0, 1, 1], [], []>} : vector<8x16xbf16>, vector<16x8xbf16>, vector<8x8xf32> -> vector<8x8xf32>
    %42 = arith.index_cast %arg0 : i32 to index
    %c2 = arith.constant 2 : index
    %43 = memref.load %arg5[%42, %c2] : memref<4x6xf32, #tpu.memory_space<smem>>
    %c0_32 = arith.constant 0 : index
    %c0_33 = arith.constant 0 : index
    %c16_34 = arith.constant 16 : index
    %44 = vector.load %arg4[%c0_32, %c0_33, %c16_34] : memref<1x8x48xf32, #tpu.memory_space<vmem>>, vector<1x8x8xf32>
    %45 = vector.shape_cast %44 : vector<1x8x8xf32> to vector<8x8xf32>
    %46 = vector.broadcast %43 : f32 to vector<8x8xf32>
    %47 = arith.mulf %46, %45 : vector<8x8xf32>
    %48 = arith.addf %41, %47 : vector<8x8xf32>
    %cst_35 = arith.constant 0.000000e+00 : f32
    %cst_36 = arith.constant 1.000000e+00 : f32
    %49 = vector.broadcast %cst_35 : f32 to vector<8x8xf32>
    %50 = arith.maximumf %49, %48 : vector<8x8xf32>
    %51 = vector.broadcast %cst_36 : f32 to vector<8x8xf32>
    %52 = arith.minimumf %51, %50 : vector<8x8xf32>
    %c0_37 = arith.constant 0 : index
    %c0_38 = arith.constant 0 : index
    %c16_39 = arith.constant 16 : index
    %53 = vector.load %arg6[%c0_37, %c0_38, %c16_39] : memref<1x8x48xf32, #tpu.memory_space<vmem>>, vector<1x8x8xf32>
    %54 = vector.shape_cast %53 : vector<1x8x8xf32> to vector<8x8xf32>
    %55 = vector.shape_cast %52 : vector<8x8xf32> to vector<1x8x8xf32>
    tpu.vector_store %arg6[%c0_37, %c0_38, %c16_39], %55 {strides = array<i32>} : memref<1x8x48xf32, #tpu.memory_space<vmem>>, vector<1x8x8xf32>,
    %c48 = arith.constant 48 : index
    %c0_40 = arith.constant 0 : index
    %56 = vector.load %arg7[%c48, %c0_40] : memref<96x8xbf16, #tpu.memory_space<vmem>>, vector<16x8xbf16>
    %cst_41 = arith.constant dense<0.000000e+00> : vector<8x8xf32>
    %57 = tpu.matmul %7, %56, %cst_41 {dimension_numbers = #tpu.dot_dimension_numbers<[1], [0], [0], [1], [0, 0, 1, 1], [], []>} : vector<8x16xbf16>, vector<16x8xbf16>, vector<8x8xf32> -> vector<8x8xf32>
    %58 = arith.index_cast %arg0 : i32 to index
    %c3 = arith.constant 3 : index
    %59 = memref.load %arg5[%58, %c3] : memref<4x6xf32, #tpu.memory_space<smem>>
    %c0_42 = arith.constant 0 : index
    %c0_43 = arith.constant 0 : index
    %c24 = arith.constant 24 : index
    %60 = vector.load %arg4[%c0_42, %c0_43, %c24] : memref<1x8x48xf32, #tpu.memory_space<vmem>>, vector<1x8x8xf32>
    %61 = vector.shape_cast %60 : vector<1x8x8xf32> to vector<8x8xf32>
    %62 = vector.broadcast %59 : f32 to vector<8x8xf32>
    %63 = arith.mulf %62, %61 : vector<8x8xf32>
    %64 = arith.addf %57, %63 : vector<8x8xf32>
    %cst_44 = arith.constant 0.000000e+00 : f32
    %cst_45 = arith.constant 1.000000e+00 : f32
    %65 = vector.broadcast %cst_44 : f32 to vector<8x8xf32>
    %66 = arith.maximumf %65, %64 : vector<8x8xf32>
    %67 = vector.broadcast %cst_45 : f32 to vector<8x8xf32>
    %68 = arith.minimumf %67, %66 : vector<8x8xf32>
    %c0_46 = arith.constant 0 : index
    %c0_47 = arith.constant 0 : index
    %c24_48 = arith.constant 24 : index
    %69 = vector.load %arg6[%c0_46, %c0_47, %c24_48] : memref<1x8x48xf32, #tpu.memory_space<vmem>>, vector<1x8x8xf32>
    %70 = vector.shape_cast %69 : vector<1x8x8xf32> to vector<8x8xf32>
    %71 = vector.shape_cast %68 : vector<8x8xf32> to vector<1x8x8xf32>
    tpu.vector_store %arg6[%c0_46, %c0_47, %c24_48], %71 {strides = array<i32>} : memref<1x8x48xf32, #tpu.memory_space<vmem>>, vector<1x8x8xf32>,
    %c64 = arith.constant 64 : index
    %c0_49 = arith.constant 0 : index
    %72 = vector.load %arg7[%c64, %c0_49] : memref<96x8xbf16, #tpu.memory_space<vmem>>, vector<16x8xbf16>
    %cst_50 = arith.constant dense<0.000000e+00> : vector<8x8xf32>
    %73 = tpu.matmul %7, %72, %cst_50 {dimension_numbers = #tpu.dot_dimension_numbers<[1], [0], [0], [1], [0, 0, 1, 1], [], []>} : vector<8x16xbf16>, vector<16x8xbf16>, vector<8x8xf32> -> vector<8x8xf32>
    %74 = arith.index_cast %arg0 : i32 to index
    %c4 = arith.constant 4 : index
    %75 = memref.load %arg5[%74, %c4] : memref<4x6xf32, #tpu.memory_space<smem>>
    %c0_51 = arith.constant 0 : index
    %c0_52 = arith.constant 0 : index
    %c32_53 = arith.constant 32 : index
    %76 = vector.load %arg4[%c0_51, %c0_52, %c32_53] : memref<1x8x48xf32, #tpu.memory_space<vmem>>, vector<1x8x8xf32>
    %77 = vector.shape_cast %76 : vector<1x8x8xf32> to vector<8x8xf32>
    %78 = vector.broadcast %75 : f32 to vector<8x8xf32>
    %79 = arith.mulf %78, %77 : vector<8x8xf32>
    %80 = arith.addf %73, %79 : vector<8x8xf32>
    %cst_54 = arith.constant 0.000000e+00 : f32
    %cst_55 = arith.constant 1.000000e+00 : f32
    %81 = vector.broadcast %cst_54 : f32 to vector<8x8xf32>
    %82 = arith.maximumf %81, %80 : vector<8x8xf32>
    %83 = vector.broadcast %cst_55 : f32 to vector<8x8xf32>
    %84 = arith.minimumf %83, %82 : vector<8x8xf32>
    %c0_56 = arith.constant 0 : index
    %c0_57 = arith.constant 0 : index
    %c32_58 = arith.constant 32 : index
    %85 = vector.load %arg6[%c0_56, %c0_57, %c32_58] : memref<1x8x48xf32, #tpu.memory_space<vmem>>, vector<1x8x8xf32>
    %86 = vector.shape_cast %85 : vector<1x8x8xf32> to vector<8x8xf32>
    %87 = vector.shape_cast %84 : vector<8x8xf32> to vector<1x8x8xf32>
    tpu.vector_store %arg6[%c0_56, %c0_57, %c32_58], %87 {strides = array<i32>} : memref<1x8x48xf32, #tpu.memory_space<vmem>>, vector<1x8x8xf32>,
    %c80 = arith.constant 80 : index
    %c0_59 = arith.constant 0 : index
    %88 = vector.load %arg7[%c80, %c0_59] : memref<96x8xbf16, #tpu.memory_space<vmem>>, vector<16x8xbf16>
    %cst_60 = arith.constant dense<0.000000e+00> : vector<8x8xf32>
    %89 = tpu.matmul %7, %88, %cst_60 {dimension_numbers = #tpu.dot_dimension_numbers<[1], [0], [0], [1], [0, 0, 1, 1], [], []>} : vector<8x16xbf16>, vector<16x8xbf16>, vector<8x8xf32> -> vector<8x8xf32>
    %90 = arith.index_cast %arg0 : i32 to index
    %c5 = arith.constant 5 : index
    %91 = memref.load %arg5[%90, %c5] : memref<4x6xf32, #tpu.memory_space<smem>>
    %c0_61 = arith.constant 0 : index
    %c0_62 = arith.constant 0 : index
    %c40 = arith.constant 40 : index
    %92 = vector.load %arg4[%c0_61, %c0_62, %c40] : memref<1x8x48xf32, #tpu.memory_space<vmem>>, vector<1x8x8xf32>
    %93 = vector.shape_cast %92 : vector<1x8x8xf32> to vector<8x8xf32>
    %94 = vector.broadcast %91 : f32 to vector<8x8xf32>
    %95 = arith.mulf %94, %93 : vector<8x8xf32>
    %96 = arith.addf %89, %95 : vector<8x8xf32>
    %cst_63 = arith.constant 0.000000e+00 : f32
    %cst_64 = arith.constant 1.000000e+00 : f32
    %97 = vector.broadcast %cst_63 : f32 to vector<8x8xf32>
    %98 = arith.maximumf %97, %96 : vector<8x8xf32>
    %99 = vector.broadcast %cst_64 : f32 to vector<8x8xf32>
    %100 = arith.minimumf %99, %98 : vector<8x8xf32>
    %c0_65 = arith.constant 0 : index
    %c0_66 = arith.constant 0 : index
    %c40_67 = arith.constant 40 : index
    %101 = vector.load %arg6[%c0_65, %c0_66, %c40_67] : memref<1x8x48xf32, #tpu.memory_space<vmem>>, vector<1x8x8xf32>
    %102 = vector.shape_cast %101 : vector<1x8x8xf32> to vector<8x8xf32>
    %103 = vector.shape_cast %100 : vector<8x8xf32> to vector<1x8x8xf32>
    tpu.vector_store %arg6[%c0_65, %c0_66, %c40_67], %103 {strides = array<i32>} : memref<1x8x48xf32, #tpu.memory_space<vmem>>, vector<1x8x8xf32>,
    return
  }
  func.func @transform_0(%arg0: i32) -> (i32, i32, i32) {
    %c0_i32 = arith.constant 0 : i32
    %c0_i32_0 = arith.constant 0 : i32
    %c0_i32_1 = arith.constant 0 : i32
    return %arg0, %c0_i32, %c0_i32_0 : i32, i32, i32
  }
  func.func @transform_1(%arg0: i32) -> (i32, i32, i32) {
    %c0_i32 = arith.constant 0 : i32
    %c0_i32_0 = arith.constant 0 : i32
    %c0_i32_1 = arith.constant 0 : i32
    return %arg0, %c0_i32, %c0_i32_0 : i32, i32, i32
  }
  func.func @transform_2(%arg0: i32) -> (i32, i32) {
    %c0_i32 = arith.constant 0 : i32
    %c0_i32_0 = arith.constant 0 : i32
    %c0_i32_1 = arith.constant 0 : i32
    return %c0_i32, %c0_i32_0 : i32, i32
  }
  func.func @transform_3(%arg0: i32) -> (i32, i32, i32) {
    %c0_i32 = arith.constant 0 : i32
    %c0_i32_0 = arith.constant 0 : i32
    %c0_i32_1 = arith.constant 0 : i32
    return %arg0, %c0_i32, %c0_i32_0 : i32, i32, i32
  }
  func.func @transform_4(%arg0: i32) -> (i32, i32) {
    %c0_i32 = arith.constant 0 : i32
    %c0_i32_0 = arith.constant 0 : i32
    %c0_i32_1 = arith.constant 0 : i32
    return %c0_i32, %c0_i32_0 : i32, i32
  }
  func.func @transform_5(%arg0: i32) -> (i32, i32, i32) {
    %c0_i32 = arith.constant 0 : i32
    %c0_i32_0 = arith.constant 0 : i32
    %c0_i32_1 = arith.constant 0 : i32
    return %arg0, %c0_i32, %c0_i32_0 : i32, i32, i32
  }
}

</mosaic_0001>

<bundles_post_ra>
// kernel: tpu_custom_call.1
= control target key start
LH: loop header
LB: loop body
LE: loop exit
PB: predicated region body
PF: predicated region fallthrough
CT: control target
= control target key end

     0   :  { %10 = vsyncpa [#allocation5], 0  ;;  %s1524_s0 = inlined_call_operand.vmem [shape: bf16[4,8,16], index: 0, kind: input, shape index: {}]   ;;  %s1525_s1 = inlined_call_operand.vmem [shape: bf16[4,16,8], index: 1, kind: input, shape index: {}]   ;;  %s1526_s2 = inlined_call_operand.vmem [shape: bf16[96,16], index: 2, kind: input, shape index: {}]   ;;  %s1527_s3 = inlined_call_operand.vmem [shape: f32[4,8,48], index: 3, kind: input, shape index: {}]   ;;  %s1528_s4 = inlined_call_operand.vmem [shape: f32[4,6], index: 4, kind: input, shape index: {}]   ;;  %s1529_s5 = inlined_call_operand.hbm [shape: f32[4,8,48], index: 5, kind: output, shape index: {}]  }
   0x1   :  { %11 = vsyncpa [#allocation4], 0 }
   0x2   :  { %13 = vsyncpa [#allocation4 + $0x1], 0  ;;  %s1313_s18 = smov 0   ;;  %s1315_s19 = smov 0  }
   0x3   :  { %s1317_s20 = smov 0   ;;  %s1319_s21 = smov 0  }
   0x4 LB: > { %s1334_s22 = sadd.s32 4294967295, %s1267_s21   ;;  %s978_s23 = sadd.s32 4294967294, %s1267_s21   ;;  %s1267_s21 = sphi %s1319_s21, %s1536_s21   ;;  %s1263_s20 = sphi %s1317_s20, %s1535_s20   ;;  %s1259_s19 = sphi %s1315_s19, %s1534_s19   ;;  %s1255_s18 = sphi %s1313_s18, %s1533_s18  }
   0x5   : > { %s1338_s24 = sadd.s32 1, %s1267_s21   ;;  %s146_s25 = sadd.s32 1, %s1263_s20 }
   0x6   : > { %s143_s26 = ssub.s32 %s1267_s21, %s1338_s24  ;;  %p156_p0 = scmp.ne.s32.totalorder %s1263_s20, %s1259_s19 }
   0x7   : > { %p144_p1 = scmp.eq.s32.totalorder %s143_s26, 0  ;;  %p157_p2 = scmp.eq.s32.totalorder %s1334_s22, 3 }
   0x8   : > { %p162_p3 = scmp.ne.s32.totalorder %s1259_s19, %s1255_s18  ;;  %p163_p4 = scmp.eq.s32.totalorder %s978_s23, 3 }
   0x9   : > { %s1349_s27 = scalar_select %p144_p1, %s1263_s20, %s146_s25  }
   0xa   : > { %p1351_p5 = por %p157_p2, %p156_p0  ;;  %p1355_p6 = por %p163_p4, %p162_p3 }
   0xb   : > { %p979_p7 = scmp.ge.s32.totalorder %s1267_s21, 1  ;;  %p170_p8 = scmp.lt.s32.totalorder %s1267_s21, 5 }
   0xc   : > { %p1127_p9 = scmp.eq.s32.totalorder %s1334_s22, 0  ;;  %s186_s8 = sshll.u32 %s1528_s4, 4  ;;  %s187_s8 = int_to_ptr.vmem [resolvable:$true] %s186_s8 }
   0xd   : > { %p1362_p10 = pnand %p979_p7, %p170_p8  ;;  %s1188_s9 = scalar_lea.vmem %s187_s8, 64 }
   0xe   : > { %p1189_p13 = scmp.ne.s32.totalorder %s187_s8, %s1188_s9  ;;  %p1196_p3 = scmp.lt.s32.totalorder %s187_s8, %s187_s8 }
   0xf   : > { %p1119_p11 = pneg %p1362_p10  ;;  %p1197_p4 = scmp.lt.s32.totalorder %s1188_s9, %s1188_s9 }
  0x11   : > { %p1120_p12 = pnand %p1127_p9, %p1119_p11  ;;  %p1198_p7 = por %p1197_p4, %p1196_p3 }
  0x13   : > { %p1190_p0 = pneg %p1120_p12 }
  0x15   : > { %p1191_p1 = pnand %p1190_p0, %p1189_p13 }
  0x17   : > { %p1192_p2 = pneg %p1191_p1 }
  0x19   : > { %p1199_p8 = pnand %p1198_p7, %p1192_p2 }
  0x1b   : > { %1202 = shalt.err (!%p1199_p8)
}
  0x1c   : > { %s1269_s10 = smov [#allocation3]   ;;  %221 = sbr.rel (%p1362_p10) target bundleno = 611 (0x263), region = 40 }
  0x1d   : > { %1122 = dma.vmem_to_smem (!%p1120_p12), %s187_s8, 64, %s1269_s10, [#allocation5]  }
  0x21   : > { %1246 = dma.done.wait (%p1127_p9), [#allocation5], 64  }
  0x22   : > { %1248 = vsyncadd (%p1127_p9), [#allocation5], 4294967232 }
  0x23   : > { %227 = sfence }
  0x24   : > { %p258_p11 = scmp.lt.s32.totalorder %s1334_s22, 3  ;;  %v1176_v0 = vld [vmem:[%s1526_s2] sm:$0xff]   ;;  %vm322_vm0 = vcmask 130048   ;;  %v1177_v2 = vld [vmem:[%s1526_s2 + $0x8] sm:$0xff]   ;;  %v1178_v3 = vld [vmem:[%s1526_s2 + $0x10] sm:$0xff]   ;;  %v1270_v7 = vmov 0.0  }
  0x25   : > { %1065 = vmatprep.mubr.msk.bf16.mxu0 %vm322_vm0, %v1176_v0  ;;  %v1179_v4 = vld [vmem:[%s1526_s2 + $0x18] sm:$0xff]   ;;  %v1180_v5 = vld [vmem:[%s1526_s2 + $0x20] sm:$0xff]   ;;  %v1181_v6 = vld [vmem:[%s1526_s2 + $0x28] sm:$0xff]   ;;  %1077 = vmatprep.subr.bf16.mxu1 %v1270_v7  ;;  %vm1271_vm1 = vmmov 0   ;;  %s1418_s12 = sshll.u32 %s1334_s22, 7  ;;  %s1272_s11 = smov 104  }
  0x26   : > { %s1384_s13 = scalar_select %p258_p11, %s1334_s22, 3  ;;  %1079 = vmatprep.mubr.msk.bf16.mxu1 %vm1271_vm1, %v1270_v7  ;;  %vm470_vm2 = vcmask 60416   ;;  %vm542_vm3 = vcmask 64512   ;;  %vm607_vm4 = vcmask 130112   ;;  %vm672_vm5 = vcmask 195712  }
  0x27   : > { %s676_s15 = sadd.s32 3, %s1418_s12  ;;  %s546_s16 = sadd.s32 1, %s1418_s12  ;;  %vm737_vm6 = vcmask 261312   ;;  %vm802_vm7 = vcmask 326912   ;;  %vm867_vm8 = vcmask 392512  }
  0x28   : > { %s1031_s14 = sshll.u32 %s1384_s13, 3  ;;  %s677_s26 = sld [smem:[#allocation3 + %s676_s15]] }
  0x29   : > { %s266_s17 = scalar_lea.vmem %s1525_s1, %s1031_s14  ;;  %s270_s25 = scalar_lea.vmem %s1527_s3, %s1031_s14 }
  0x2a   : > { %v1175_v1 = vld [vmem:[%s266_s17] sm:$0xff]   ;;  %s547_s30 = sld [smem:[#allocation3 + %s546_s16]]  ;;  %s611_s6 = sadd.s32 2, %s1418_s12 }
  0x2b   : > { %1063 = vmatprep.subr.bf16.mxu0 %v1175_v1  ;;  %s612_s7 = sld [smem:[#allocation3 + %s611_s6]]  ;;  %s741_s8 = sadd.s32 4, %s1418_s12  ;;  %v1427_v8 = vld [vmem:[%s270_s25] sm:$0xff] }
  0x2c   : > { %1064 = vmatpush3.bf16.msra.mxu0 %v1175_v1  ;;  %s742_s22 = sld [smem:[#allocation3 + %s741_s8]]  ;;  %s806_s9 = sadd.s32 5, %s1418_s12 }
  0x2d   : > { %1095 = vmatprep.subr.bf16.mxu0 %v1270_v7  ;;  %s807_s10 = sld [smem:[#allocation3 + %s806_s9]]  ;;  %s1273_s14 = smov 120  }
  0x2e   : > { %v679_v9 = vstv %s677_s26  ;;  %s1274_s15 = smov 96   ;;  %s1275_s16 = smov 112  }
  0x2f   : > { %1066 = vmatmul.mubr.msk.bf16.vlgmr.msra.gmra.mxu0 %vm322_vm0, %v1177_v2  ;;  %v680_v10 = vmul.f32 %v679_v9, %v1427_v8  ;;  %s1276_s17 = smov 88   ;;  %s985_s23 = sshll.u32 %s1384_s13, 2 }
  0x30   : > { %1069 = vmatprep.mubr.msk.bf16.mxu0 %vm322_vm0, %v1178_v3  ;;  %v549_v11 = vstv %s547_s30  ;;  %s261_s30 = scalar_lea.vmem %s1524_s0, %s985_s23  ;;  %s487_s13 = sld [smem:[#allocation3 + %s1418_s12]] }
  0x31   : > { %v550_v12 = vmul.f32 %v1427_v8, %v549_v11  ;;  %v614_v13 = vstv %s612_s7  ;;  %688 = vrot.lane.b32.xlu1 %v680_v10, %s1272_s11  ;;  %v483_v38 = vld [vmem:[%s261_s30] sm:$0xf]  ;;  %s255_s6 = sand.u32 1, %s1259_s19   ;;  %s1278_s9 = smov 8  }
  0x32   : > { %v615_v14 = vmul.f32 %v1427_v8, %v614_v13  ;;  %v744_v15 = vstv %s742_s22  ;;  %s984_s7 = sshll.u32 %s255_s6, 3  ;;  %s1277_s22 = smov 24  }
  0x33   : > { %558 = vrot.lane.b32.xlu0 %v550_v12, %s1273_s14  ;;  %v745_v16 = vmul.f32 %v744_v15, %v1427_v8  ;;  %v809_v17 = vstv %s807_s10  ;;  %s1474_s8 = scalar_lea.vmem [#allocation6], %s984_s7  ;;  %s1279_s10 = smov 40  }
  0x34   : > { %v810_v18 = vmul.f32 %v809_v17, %v1427_v8  ;;  %s1280_s11 = smov 16   ;;  %s1281_s14 = smov 32  }
  0x35   : > { %753 = vrot.lane.b32.xlu1 %v745_v16, %s1274_s15  ;;  %s883_s15 = sshll.u32 %s1474_s8, 4  ;;  %s1485_s23 = scalar_lea.hbm %s1529_s5, %s1418_s12  ;;  %s884_s15 = int_to_ptr.vmem [resolvable:$true] %s883_s15 }
  0x36   : > { %v489_v50 = vstv %s487_s13  ;;  %s870_s25 = scalar_lea.sflag [#allocation4], %s255_s6  ;;  %s1203_s26 = scalar_lea.vmem %s884_s15, 128 }
  0x37   : > { %1070 = vmatmul.mubr.msk.bf16.gmra.mxu0 %vm322_vm0, %v1179_v4  ;;  %623 = vrot.lane.b32.xlu0 %v615_v14, %s1275_s16  ;;  %v490_v51 = vmul.f32 %v1427_v8, %v489_v50  ;;  %p1204_p9 = scmp.ne.s32.totalorder %s884_s15, %s1203_s26  ;;  %s1282_s30 = smov [#allocation6]  }
  0x38   : > { %1073 = vmatprep.mubr.msk.bf16.mxu0 %vm322_vm0, %v1180_v5  ;;  %s1207_s13 = sshll.u32 %s1282_s30, 4  ;;  %s1208_s13 = int_to_ptr.vmem [resolvable:$false] %s1207_s13 }
  0x39   : > { %p1205_p10 = pnand %p1204_p9, %p1351_p5  ;;  %s1209_s7 = scalar_lea.vmem %s1208_s13, 256 }
  0x3a   : > { %p1210_p13 = scmp.lt.s32.totalorder %s884_s15, %s1208_s13  ;;  %p1211_p0 = scmp.lt.s32.totalorder %s1209_s7, %s1203_s26 }
  0x3b   : > { %818 = vrot.lane.b32.xlu0 %v810_v18, %s1276_s17  ;;  %p1206_p12 = pneg %p1205_p10 }
  0x3c   : > { %p1212_p1 = por %p1211_p0, %p1210_p13 }
  0x3e   : > { %p1213_p2 = pnand %p1212_p1, %p1206_p12 }
  0x3f   : > { %1074 = vmatmul.mubr.msk.bf16.gmra.mxu0 %vm322_vm0, %v1181_v6 }
  0x40   : > { %1097 = vmatprep.mubr.msk.bf16.mxu0 %vm1271_vm1, %v1270_v7 }
  0xa3   : > { %v689_v58 = vpop.permute.xlu1 %688 }
  0xa5   : > { %v559_v56 = vpop.permute.xlu0 %558 }
  0xa9   : > { %v624_v63 = vpop.permute.xlu0 %623 }
  0xad   : > { %v819_v8 = vpop.permute.xlu0 %818 }
  0xef   : > { %v1067_v19 = vpop.f32.mrf.mxu0 }
  0xf0   : > { %v1034_v20 = vpack.c.bf16 %v1067_v19, %v1067_v19 }
  0xf1   : > { %v375_v21 = vpop.f32.mrf.mxu0 }
  0xf2   : > { %473 = vst.msk [vmem:[#allocation2 + $0x8] sm:$0xf] %vm470_vm2, %v1034_v20  ;;  %v1032_v22 = vpack.c.bf16 %v375_v21, %v375_v21 }
  0xf3   : > { %v1068_v23 = vpop.f32.mrf.mxu0 }
  0xf4   : > { %471 = vst.msk [vmem:[#allocation2] sm:$0xf] %vm470_vm2, %v1032_v22  ;;  %v1035_v24 = vpack.c.bf16 %v1068_v23, %v1068_v23 }
  0xf5   : > { %v378_v25 = vpop.f32.mrf.mxu0 }
  0xf6   : > { %474 = vst.msk [vmem:[#allocation2 + $0xc] sm:$0xf] %vm470_vm2, %v1035_v24  ;;  %v1033_v26 = vpack.c.bf16 %v378_v25, %v378_v25 }
  0xf7   : > { %v1071_v27 = vpop.f32.mrf.mxu0 }
  0xf8   : > { %472 = vst.msk [vmem:[#allocation2 + $0x4] sm:$0xf] %vm470_vm2, %v1033_v26  ;;  %v1038_v28 = vpack.c.bf16 %v1071_v27, %v1071_v27  ;;  %v754_v27 = vpop.permute.xlu1 %753 }
  0xf9   : > { %v391_v29 = vpop.f32.mrf.mxu0 }
  0xfa   : > { %477 = vst.msk [vmem:[#allocation2 + $0x18] sm:$0xf] %vm470_vm2, %v1038_v28  ;;  %v1036_v30 = vpack.c.bf16 %v391_v29, %v391_v29 }
  0xfb   : > { %v1072_v31 = vpop.f32.mrf.mxu0 }
  0xfc   : > { %475 = vst.msk [vmem:[#allocation2 + $0x10] sm:$0xf] %vm470_vm2, %v1036_v30  ;;  %v1039_v32 = vpack.c.bf16 %v1072_v31, %v1072_v31 }
  0xfd   : > { %v394_v33 = vpop.f32.mrf.mxu0  ;;  %v1183_v41 = vld [vmem:[#allocation2 + $0x8] sm:$0xff]  }
  0xfe   : > { %478 = vst.msk [vmem:[#allocation2 + $0x1c] sm:$0xf] %vm470_vm2, %v1039_v32  ;;  %v1037_v34 = vpack.c.bf16 %v394_v33, %v394_v33 }
  0xff   : > { %v1182_v35 = vld [vmem:[#allocation2] sm:$0xff]   ;;  %v1075_v36 = vpop.f32.mrf.mxu0 }
 0x100   : > { %476 = vst.msk [vmem:[#allocation2 + $0x14] sm:$0xf] %vm470_vm2, %v1037_v34  ;;  %v1042_v37 = vpack.c.bf16 %v1075_v36, %v1075_v36  ;;  %1078 = vmatpush3.bf16.msra.mxu1 %v1182_v35 }
 0x101   : > { %v407_v39 = vpop.f32.mrf.mxu0  ;;  %1083 = vmatprep.subr.bf16.mxu1 %v1270_v7 }
 0x102   : > { %481 = vst.msk [vmem:[#allocation2 + $0x28] sm:$0xf] %vm470_vm2, %v1042_v37  ;;  %v1040_v40 = vpack.c.bf16 %v407_v39, %v407_v39 }
 0x103   : > { %v1076_v42 = vpop.f32.mrf.mxu0  ;;  %1080 = vmatmul.mubr.msk.bf16.vlgmr.msra.gmra.mxu1 %vm322_vm0, %v483_v38 }
 0x104   : > { %479 = vst.msk [vmem:[#allocation2 + $0x20] sm:$0xf] %vm470_vm2, %v1040_v40  ;;  %v1043_v43 = vpack.c.bf16 %v1076_v42, %v1076_v42  ;;  %1084 = vmatpush3.bf16.msra.mxu1 %v1183_v41  ;;  %1085 = vmatprep.mubr.msk.bf16.mxu1 %vm1271_vm1, %v1270_v7 }
 0x105   : > { %v1184_v44 = vld [vmem:[#allocation2 + $0x18] sm:$0xff]   ;;  %v410_v45 = vpop.f32.mrf.mxu0  ;;  %1089 = vmatprep.subr.bf16.mxu1 %v1270_v7 }
 0x106   : > { %482 = vst.msk [vmem:[#allocation2 + $0x2c] sm:$0xf] %vm470_vm2, %v1043_v43  ;;  %v1041_v46 = vpack.c.bf16 %v410_v45, %v410_v45  ;;  %1096 = vmatpush3.bf16.msra.mxu0 %v1184_v44 }
 0x107   : > { %1107 = vmatprep.subr.bf16.mxu0 %v1270_v7  ;;  %v1185_v47 = vld [vmem:[#allocation2 + $0x10] sm:$0xff]  }
 0x108   : > { %480 = vst.msk [vmem:[#allocation2 + $0x24] sm:$0xf] %vm470_vm2, %v1041_v46 }
 0x109   : > { %1098 = vmatmul.mubr.msk.bf16.vlgmr.msra.gmra.mxu0 %vm322_vm0, %v483_v38 }
 0x10a   : > { %1109 = vmatprep.mubr.msk.bf16.mxu0 %vm1271_vm1, %v1270_v7 }
 0x10b   : > { %1086 = vmatmul.mubr.msk.bf16.vlgmr.msra.gmra.mxu1 %vm322_vm0, %v483_v38 }
 0x10c   : > { %1090 = vmatpush3.bf16.msra.mxu1 %v1185_v47  ;;  %1091 = vmatprep.mubr.msk.bf16.mxu1 %vm1271_vm1, %v1270_v7 }
 0x10d   : > { %v1187_v48 = vld [vmem:[#allocation2 + $0x28] sm:$0xff]   ;;  %1101 = vmatprep.subr.bf16.mxu1 %v1270_v7 }
 0x10e   : > { %1108 = vmatpush3.bf16.msra.mxu0 %v1187_v48 }
 0x10f   : > { %v1186_v49 = vld [vmem:[#allocation2 + $0x20] sm:$0xff]  }
 0x111   : > { %1110 = vmatmul.mubr.msk.bf16.vlgmr.msra.gmra.mxu0 %vm322_vm0, %v483_v38 }
 0x113   : > { %1092 = vmatmul.mubr.msk.bf16.vlgmr.msra.gmra.mxu1 %vm322_vm0, %v483_v38 }
 0x114   : > { %1102 = vmatpush3.bf16.msra.mxu1 %v1186_v49  ;;  %1103 = vmatprep.mubr.msk.bf16.mxu1 %vm1271_vm1, %v1270_v7 }
 0x11b   : > { %1104 = vmatmul.mubr.msk.bf16.vlgmr.msra.gmra.mxu1 %vm322_vm0, %v483_v38 }
 0x1c3   : > { %v534_v52 = vpop.f32.mrf.mxu1 }
 0x1c4   : > { %v535_v53 = vadd.f32 %v534_v52, %v490_v51 }
 0x1c5   : > { %v1081_v54 = vpop.f32.mrf.mxu1 }
 0x1c6   : > { %v540_v55 = vmax.f32 %v535_v53, 0.0 }
 0x1c7   : > { %v537_v57 = vpop.f32.mrf.mxu1 }
 0x1c8   : > { %v541_v59 = vmin.f32 %v540_v55, 1.0 }
 0x1c9   : > { %v1082_v60 = vpop.f32.mrf.mxu1  ;;  %v725_v61 = vpop.f32.mrf.mxu0 }
 0x1ca   : > { %v726_v62 = vadd.f32 %v725_v61, %v689_v58  ;;  %543 = vst.msk [vmem:[%s1474_s8] sm:$0xff] %vm542_vm3, %v541_v59 }
 0x1cb   : > { %v595_v0 = vpop.f32.mrf.mxu1  ;;  %v1099_v1 = vpop.f32.mrf.mxu0 }
 0x1cc   : > { %v731_v2 = vmax.f32 %v726_v62, 0.0  ;;  %v596_v3 = vadd.f32 %v595_v0, %v559_v56 }
 0x1cd   : > { %v1087_v4 = vpop.f32.mrf.mxu1  ;;  %v728_v5 = vpop.f32.mrf.mxu0 }
 0x1ce   : > { %v732_v6 = vmin.f32 %v731_v2, 1.0  ;;  %v601_v7 = vmax.f32 %v596_v3, 0.0 }
 0x1cf   : > { %v598_v9 = vpop.f32.mrf.mxu1  ;;  %v1100_v10 = vpop.f32.mrf.mxu0 }
 0x1d0   : > { %734 = vrot.lane.b32.xlu1 %v732_v6, %s1277_s22  ;;  %v602_v13 = vmin.f32 %v601_v7, 1.0 }
 0x1d1   : > { %v1088_v11 = vpop.f32.mrf.mxu1  ;;  %v855_v12 = vpop.f32.mrf.mxu0 }
 0x1d2   : > { %v856_v14 = vadd.f32 %v855_v12, %v819_v8 }
 0x1d3   : > { %v660_v15 = vpop.f32.mrf.mxu1  ;;  %v1111_v16 = vpop.f32.mrf.mxu0 }
 0x1d4   : > { %604 = vrot.lane.b32.xlu1 %v602_v13, %s1278_s9  ;;  %v661_v17 = vadd.f32 %v660_v15, %v624_v63  ;;  %v861_v18 = vmax.f32 %v856_v14, 0.0 }
 0x1d5   : > { %v1093_v19 = vpop.f32.mrf.mxu1  ;;  %v858_v20 = vpop.f32.mrf.mxu0 }
 0x1d6   : > { %v666_v21 = vmax.f32 %v661_v17, 0.0  ;;  %v862_v22 = vmin.f32 %v861_v18, 1.0 }
 0x1d7   : > { %v663_v23 = vpop.f32.mrf.mxu1  ;;  %v1112_v24 = vpop.f32.mrf.mxu0 }
 0x1d8   : > { %v667_v25 = vmin.f32 %v666_v21, 1.0  ;;  %864 = vrot.lane.b32.xlu1 %v862_v22, %s1279_s10 }
 0x1d9   : > { %v1094_v26 = vpop.f32.mrf.mxu1 }
 0x1da   : > { %669 = vrot.lane.b32.xlu0 %v667_v25, %s1280_s11 }
 0x1db   : > { %v790_v28 = vpop.f32.mrf.mxu1 }
 0x1dc   : > { %v791_v29 = vadd.f32 %v790_v28, %v754_v27 }
 0x1dd   : > { %v1105_v30 = vpop.f32.mrf.mxu1 }
 0x1de   : > { %v796_v31 = vmax.f32 %v791_v29, 0.0 }
 0x1df   : > { %v793_v32 = vpop.f32.mrf.mxu1 }
 0x1e0   : > { %v797_v33 = vmin.f32 %v796_v31, 1.0 }
 0x1e1   : > { %v1106_v34 = vpop.f32.mrf.mxu1 }
 0x1e2   : > { %799 = vrot.lane.b32.xlu0 %v797_v33, %s1281_s14 }
 0x242   : > { %v735_v35 = vpop.permute.xlu1 %734 }
 0x246   : > { %v605_v36 = vpop.permute.xlu1 %604 }
 0x247   : > { %608 = vst.msk [vmem:[%s1474_s8] sm:$0xff] %vm607_vm4, %v605_v36 }
 0x24a   : > { %v865_v38 = vpop.permute.xlu1 %864 }
 0x24c   : > { %v670_v37 = vpop.permute.xlu0 %669 }
 0x24d   : > { %673 = vst.msk [vmem:[%s1474_s8] sm:$0xff] %vm672_vm5, %v670_v37 }
 0x24e   : > { %738 = vst.msk [vmem:[%s1474_s8] sm:$0xff] %vm737_vm6, %v735_v35 }
 0x254   : > { %v800_v39 = vpop.permute.xlu0 %799 }
 0x255   : > { %803 = vst.msk [vmem:[%s1474_s8] sm:$0xff] %vm802_vm7, %v800_v39 }
 0x256   : > { %868 = vst.msk [vmem:[%s1474_s8] sm:$0xff] %vm867_vm8, %v865_v38 }
 0x257   : > { %1216 = shalt.err (!%p1213_p2)
}
 0x258   : > { %s1217_s12 = scalar_lea.hbm %s1485_s23, 128  ;;  %s1221_s22 = scalar_lea.hbm %s1529_s5, 512 }
 0x259   : > { %p1218_p3 = scmp.ne.s32.totalorder %s1485_s23, %s1217_s12  ;;  %p1222_p8 = scmp.lt.s32.totalorder %s1485_s23, %s1529_s5 }
 0x25a   : > { %p1223_p11 = scmp.lt.s32.totalorder %s1221_s22, %s1217_s12 }
 0x25b   : > { %p1219_p4 = pnand %p1218_p3, %p1351_p5 }
 0x25c   : > { %p1224_p9 = por %p1223_p11, %p1222_p8 }
 0x25d   : > { %p1220_p7 = pneg %p1219_p4 }
 0x25f   : > { %p1225_p10 = pnand %p1224_p9, %p1220_p7 }
 0x261   : > { %1228 = shalt.err (!%p1225_p10)
}
 0x262   : > { %1117 = dma.vmem_to_hbm [thread:$0]  (%p1351_p5), %s884_s15, 128, %s1485_s23, %s870_s25  }
 0x263 PF: > { %p1129_p12 = scmp.ge.s32.totalorder %s1267_s21, 2  ;;  %s895_s11 = sand.u32 1, %s1255_s18  }
 0x264   : > { %s896_s14 = scalar_lea.sflag [#allocation4], %s895_s11 }
 0x265   : > { %p1124_p13 = pnand %p1129_p12, %p1355_p6 }
 0x267   : > { %p1125_p0 = pneg %p1124_p13 }
 0x269   : > { %1250 = dma.done.wait (%p1125_p0), %s896_s14, 128  }
 0x26a   : > { %1252 = vsyncadd (%p1125_p0), %s896_s14, 4294967168  ;;  %p16_p1 = scmp.ge.s32.totalorder %s1338_s24, 6   ;;  %s1533_s18 = smov %s1259_s19 }
 0x26b   : > { %s1534_s19 = smov %s1263_s20  ;;  %s1535_s20 = smov %s1349_s27 }
 0x26c   : > { %s1536_s21 = smov %s1338_s24  ;;  %18 = sbr.rel (!%p16_p1) target bundleno = 4 (0x4), region = 86 }
 0x271   :  { %901 = vsyncpa [#allocation4], 1 }
 0x272   :  { %903 = vsyncpa [#allocation4 + $0x1], 1 }
 0x273   :  { %904 = vsyncpa [#allocation5], 1 }
 0x274   :  { %906 = vsyncpa [#allocation5 + $0x1], 1 }

</bundles_post_ra>
